<compile_context>
chip_gen: v7x
topology: tpu7x:2x2x1
jax: 0.10.0
libtpu: 0.0.40
codegen_flags: <defaults>
</compile_context>

<pallas_src>
import math

import jax
import jax.numpy as jnp
from jax.experimental import pallas as pl
from jax.experimental.pallas import tpu as pltpu


def _cmvn_kernel(x_ref, mean_ref, scale_ref, o_ref):
    # x_ref: (ROWS, L); mean_ref/scale_ref: (1, L) broadcast over rows.
    x = x_ref[...].astype(jnp.float32)
    o_ref[...] = ((x - mean_ref[...]) * scale_ref[...]).astype(o_ref.dtype)


def _vmem_capacity_bytes():
    """Best-effort query of per-core VMEM capacity (conservative fallback)."""
    try:
        return int(pltpu.get_tpu_info().vmem_capacity_bytes)
    except Exception:
        return 64 * 1024 * 1024  # assume the smallest current gen (v7x)


def cmvn(x, mean, istd, norm_var: bool = True):
    """Pallas CMVN: (x - mean) [* istd].

    Args:
      x:    (B, T, D) float array
      mean: (D,) float array
      istd: (D,) float array (inverse std)
      norm_var: whether to multiply by istd
    """
    B, T, D = x.shape
    assert mean.shape == (D,) and istd.shape == (D,)

    rows = B * T
    x2 = x.reshape(rows, D)

    # --- Lane-densify: fold k rows into one lane row so lane dim % 128 == 0.
    # Pad the row count to a multiple of k so this path is (almost) universal.
    k = (D * 128 // math.gcd(D, 128)) // D  # lcm(D, 128) // D
    lane_cap = 16384
    pad_rows = 0
    if k * D <= lane_cap:
        pad_rows = (-rows) % k
        if pad_rows:
            x2 = jnp.pad(x2, ((0, pad_rows), (0, 0)))
        rows_p = rows + pad_rows
        lane_d = k * D
        n_rows = rows_p // k
        x2 = x2.reshape(n_rows, lane_d)
        mean_l = jnp.tile(mean, k) if k > 1 else mean
        istd_l = jnp.tile(istd, k) if k > 1 else istd
    else:
        # Very wide, 128-unfriendly D: keep D as lane dim (full-dim block).
        rows_p = rows
        lane_d = D
        n_rows = rows
        mean_l = mean
        istd_l = istd

    # f32 stats; fold norm_var into the scale vector (single kernel variant).
    mean2 = mean_l.reshape(1, lane_d).astype(jnp.float32)
    scale2 = (istd_l if norm_var else jnp.ones_like(istd_l)).reshape(
        1, lane_d).astype(jnp.float32)

    # --- Generation-aware block sizing.
    #   * 128 MiB VMEM chips (v5e/v6e): 8 MiB/buffer, vmem_limit 64 MiB.
    #   * 64 MiB  VMEM chips (v7x):     4 MiB/buffer, vmem_limit 40 MiB.
    vmem_cap = _vmem_capacity_bytes()
    if vmem_cap >= 128 * 1024 * 1024:
        max_block_bytes = 8 * 1024 * 1024
        vmem_limit = 64 * 1024 * 1024
    else:
        max_block_bytes = 4 * 1024 * 1024
        vmem_limit = min(40 * 1024 * 1024, (vmem_cap * 3) // 4)

    itemsize = jnp.dtype(x.dtype).itemsize
    sublane = max(8, 32 // itemsize)  # 8 (f32), 16 (bf16), 32 (int8)

    if n_rows >= 2 * sublane:
        # Multi-step grid: tile must be sublane-aligned (ragged tail is OK).
        cap = max(sublane,
                  (max_block_bytes // max(1, lane_d * itemsize))
                  // sublane * sublane)
        # Force >= 2 grid steps so v7x's two TensorCores both get work.
        half = ((n_rows + 1) // 2 + sublane - 1) // sublane * sublane
        tile_rows = min(cap, half)
    else:
        # Tiny input: a single full-dim block is always layout-legal.
        tile_rows = n_rows

    grid = (pl.cdiv(n_rows, tile_rows),)

    n_elems = n_rows * lane_d
    cost = pl.CostEstimate(
        flops=2 * n_elems,
        transcendentals=0,
        bytes_accessed=2 * n_elems * itemsize + 2 * lane_d * 4,
    )

    out2 = pl.pallas_call(
        _cmvn_kernel,
        out_shape=jax.ShapeDtypeStruct((n_rows, lane_d), x.dtype),
        grid_spec=pltpu.PrefetchScalarGridSpec(
            num_scalar_prefetch=0,
            grid=grid,
            in_specs=[
                pl.BlockSpec((tile_rows, lane_d), lambda i: (i, 0)),
                pl.BlockSpec((1, lane_d), lambda i: (0, 0)),
                pl.BlockSpec((1, lane_d), lambda i: (0, 0)),
            ],
            out_specs=pl.BlockSpec((tile_rows, lane_d), lambda i: (i, 0)),
        ),
        compiler_params=pltpu.CompilerParams(
            dimension_semantics=("parallel",),
            vmem_limit_bytes=vmem_limit,
        ),
        cost_estimate=cost,
    )(x2, mean2, scale2)

    out2 = out2.reshape(rows_p, D)
    if pad_rows:
        out2 = out2[:rows]
    return out2.reshape(B, T, D)


if __name__ == "__main__":
    key = jax.random.PRNGKey(0)
    k_x, k_m, k_s = jax.random.split(key, 3)

    B, T, D = 2, 8, 32
    x = jax.random.normal(k_x, (B, T, D), dtype=jnp.float32)

    # Deterministic synthetic CMVN statistics (mean.shape == istd.shape == (D,)).
    mean = jax.random.normal(k_m, (D,), dtype=jnp.float32) * 0.5
    istd = 1.0 / (0.5 + jax.nn.softplus(
        jax.random.normal(k_s, (D,), dtype=jnp.float32)))

    out = jax.block_until_ready(cmvn(x, mean, istd, norm_var=True))
    ref = (x - mean[None, None, :]) * istd[None, None, :]
    assert out.shape == (B, T, D) and out.dtype == x.dtype
    assert jnp.allclose(out, ref, atol=1e-5, rtol=1e-5)

    # norm_var=False path (mean-only normalization).
    out2 = jax.block_until_ready(cmvn(x, mean, istd, norm_var=False))
    ref2 = x - mean[None, None, :]
    assert jnp.allclose(out2, ref2, atol=1e-5, rtol=1e-5)

    # Shape where rows don't fold evenly -> row padding path (pad + slice).
    xb = jax.random.normal(k_x, (3, 7, D), dtype=jnp.float32)
    outb = jax.block_until_ready(cmvn(xb, mean, istd, norm_var=True))
    refb = (xb - mean[None, None, :]) * istd[None, None, :]
    assert outb.shape == xb.shape
    assert jnp.allclose(outb, refb, atol=1e-5, rtol=1e-5)

    # Non-128-friendly feature dim + enough rows to force a multi-step grid.
    Dc = 80
    kc_m, kc_s = jax.random.split(k_s)
    xc = jax.random.normal(k_x, (4, 64, Dc), dtype=jnp.float32)
    mean_c = jax.random.normal(kc_m, (Dc,), dtype=jnp.float32) * 0.5
    istd_c = 1.0 / (0.5 + jax.nn.softplus(
        jax.random.normal(kc_s, (Dc,), dtype=jnp.float32)))
    outc = jax.block_until_ready(cmvn(xc, mean_c, istd_c, norm_var=True))
    refc = (xc - mean_c[None, None, :]) * istd_c[None, None, :]
    assert jnp.allclose(outc, refc, atol=1e-5, rtol=1e-5)

    print("KERNEL_OK")
</pallas_src>

<mosaic_0001>
module attributes {stable_mosaic.version = 11 : i64} {
  func.func @_cmvn_kernel(%arg0: i32, %arg1: memref<4x128xf32, #tpu.memory_space<vmem>>, %arg2: memref<1x128xf32, #tpu.memory_space<vmem>>, %arg3: memref<1x128xf32, #tpu.memory_space<vmem>>, %arg4: memref<4x128xf32, #tpu.memory_space<vmem>>) attributes {dimension_semantics = [#tpu.dimension_semantics<parallel>], iteration_bounds = array<i64: 1>, scalar_prefetch = 0 : i64, scratch_operands = 0 : i64, tpu.core_type = #tpu.core_type<tc>, window_params = [{transform_indices = @transform_0, window_bounds = array<i64: 4, 128>}, {pipeline_mode = #tpu.pipeline_mode<synchronous>, transform_indices = @transform_1, window_bounds = array<i64: 1, 128>}, {pipeline_mode = #tpu.pipeline_mode<synchronous>, transform_indices = @transform_2, window_bounds = array<i64: 1, 128>}, {transform_indices = @transform_3, window_bounds = array<i64: 4, 128>}]} {
    %c0 = arith.constant 0 : index
    %c0_0 = arith.constant 0 : index
    %0 = vector.load %arg1[%c0, %c0_0] : memref<4x128xf32, #tpu.memory_space<vmem>>, vector<4x128xf32>
    %c0_1 = arith.constant 0 : index
    %c0_2 = arith.constant 0 : index
    %1 = vector.load %arg2[%c0_1, %c0_2] : memref<1x128xf32, #tpu.memory_space<vmem>>, vector<1x128xf32>
    %2 = vector.broadcast %1 : vector<1x128xf32> to vector<4x128xf32>
    %3 = arith.subf %0, %2 : vector<4x128xf32>
    %c0_3 = arith.constant 0 : index
    %c0_4 = arith.constant 0 : index
    %4 = vector.load %arg3[%c0_3, %c0_4] : memref<1x128xf32, #tpu.memory_space<vmem>>, vector<1x128xf32>
    %5 = vector.broadcast %4 : vector<1x128xf32> to vector<4x128xf32>
    %6 = arith.mulf %3, %5 : vector<4x128xf32>
    %c0_5 = arith.constant 0 : index
    %c0_6 = arith.constant 0 : index
    %7 = vector.load %arg4[%c0_5, %c0_6] : memref<4x128xf32, #tpu.memory_space<vmem>>, vector<4x128xf32>
    tpu.vector_store %arg4[%c0_5, %c0_6], %6 {strides = array<i32>} : memref<4x128xf32, #tpu.memory_space<vmem>>, vector<4x128xf32>,
    return
  }
  func.func @transform_0(%arg0: i32) -> (i32, i32) {
    %c0_i32 = arith.constant 0 : i32
    %c0_i32_0 = arith.constant 0 : i32
    return %arg0, %c0_i32 : i32, i32
  }
  func.func @transform_1(%arg0: i32) -> (i32, i32) {
    %c0_i32 = arith.constant 0 : i32
    %c0_i32_0 = arith.constant 0 : i32
    %c0_i32_1 = arith.constant 0 : i32
    return %c0_i32, %c0_i32_0 : i32, i32
  }
  func.func @transform_2(%arg0: i32) -> (i32, i32) {
    %c0_i32 = arith.constant 0 : i32
    %c0_i32_0 = arith.constant 0 : i32
    %c0_i32_1 = arith.constant 0 : i32
    return %c0_i32, %c0_i32_0 : i32, i32
  }
  func.func @transform_3(%arg0: i32) -> (i32, i32) {
    %c0_i32 = arith.constant 0 : i32
    %c0_i32_0 = arith.constant 0 : i32
    return %arg0, %c0_i32 : i32, i32
  }
}

</mosaic_0001>

<bundles_post_ra>
// kernel: tpu_custom_call.1
= control target key start
LH: loop header
LB: loop body
LE: loop exit
PB: predicated region body
PF: predicated region fallthrough
CT: control target
= control target key end

     0   :  { %8 = vsyncpa [#allocation3], 0  ;;  %s164_s0 = inlined_call_operand.hbm [shape: f32[4,128], index: 0, kind: input, shape index: {}]   ;;  %s165_s1 = inlined_call_operand.vmem [shape: f32[1,128], index: 1, kind: input, shape index: {}]   ;;  %s166_s2 = inlined_call_operand.vmem [shape: f32[1,128], index: 2, kind: input, shape index: {}]   ;;  %s167_s3 = inlined_call_operand.hbm [shape: f32[4,128], index: 3, kind: output, shape index: {}]  }
   0x1   :  { %9 = vsyncpa [#allocation4], 0  ;;  %s112_s12 = smov [#allocation2]   ;;  %s64_s16 = scalar_lea.hbm %s164_s0, 64 }
   0x2   :  { %s16_s13 = sshll.u32 %s112_s12, 4  ;;  %p65_p0 = scmp.ne.s32.totalorder %s164_s0, %s64_s16  ;;  %s17_s13 = int_to_ptr.vmem [resolvable:$true] %s16_s13 }
   0x3   :  { %p68_p1 = scmp.lt.u32.totalorder %s64_s16, %s164_s0 }
   0x5   :  { %p70_p2 = pnand %p68_p1, %p65_p0 }
   0x7   :  { %73 = shalt.err (!%p70_p2)
}
   0x8   :  { %s74_s21 = scalar_lea.vmem %s17_s13, 64  ;;  %p79_p4 = scmp.lt.s32.totalorder %s17_s13, %s17_s13 }
   0x9   :  { %p75_p3 = scmp.ne.s32.totalorder %s17_s13, %s74_s21  ;;  %p80_p5 = scmp.lt.s32.totalorder %s74_s21, %s74_s21 }
   0xb   :  { %p81_p6 = por %p80_p5, %p79_p4 }
   0xd   :  { %p82_p7 = pnand %p81_p6, %p75_p3 }
   0xf   :  { %85 = shalt.err (!%p82_p7)
}
  0x10   :  { %19 = dma.hbm_to_vmem [thread:$0]  %s164_s0, 64, %s17_s13, [#allocation3]  }
  0x11   :  { %108 = dma.done.wait [#allocation3], 64  }
  0x12   :  { %109 = vsyncadd [#allocation3], 4294967232  ;;  %s113_s24 = smov [#allocation5]   ;;  %v27_v0 = vld [vmem:[#allocation2] sm:$0xf] }
  0x13   :  { %s51_s25 = sshll.u32 %s113_s24, 4  ;;  %v60_v1 = vld [vmem:[%s165_s1] ss:$0 sm:$0xff]  ;;  %s52_s25 = int_to_ptr.vmem [resolvable:$true] %s51_s25 }
  0x14   :  { %v61_v2 = vld [vmem:[%s166_s2] ss:$0 sm:$0xff]  ;;  %v35_v3 = vsub.f32 %v27_v0, %v60_v1  ;;  %s86_s30 = scalar_lea.vmem %s52_s25, 64  ;;  %p91_p9 = scmp.lt.s32.totalorder %s52_s25, %s52_s25 }
  0x15   :  { %p87_p8 = scmp.ne.s32.totalorder %s52_s25, %s86_s30  ;;  %p92_p10 = scmp.lt.s32.totalorder %s86_s30, %s86_s30 }
  0x16   :  { %v43_v4 = vmul.f32 %v61_v2, %v35_v3 }
  0x17   :  { %p93_p11 = por %p92_p10, %p91_p9 }
  0x18   :  { %44 = vst [vmem:[#allocation5] sm:$0xf] %v43_v4 }
  0x19   :  { %p94_p12 = pnand %p93_p11, %p87_p8 }
  0x1b   :  { %97 = shalt.err (!%p94_p12)
}
  0x1c   :  { %s98_s5 = scalar_lea.hbm %s167_s3, 64 }
  0x1d   :  { %p99_p13 = scmp.ne.s32.totalorder %s167_s3, %s98_s5  ;;  %p102_p0 = scmp.lt.u32.totalorder %s98_s5, %s167_s3 }
  0x1f   :  { %p104_p1 = pnand %p102_p0, %p99_p13 }
  0x21   :  { %107 = shalt.err (!%p104_p1)
}
  0x22   :  { %54 = dma.vmem_to_hbm [thread:$0]  %s52_s25, 64, %s167_s3, [#allocation4]  }
  0x23   :  { %110 = dma.done.wait [#allocation4], 64  }
  0x24   :  { %111 = vsyncadd [#allocation4], 4294967232 }
  0x25   :  { %58 = vsyncpa [#allocation3], 1 }
  0x26   :  { %59 = vsyncpa [#allocation4], 1 }

</bundles_post_ra>
